<compile_context>
chip_gen: v7x
topology: tpu7x:2x2x1
jax: 0.10.0
libtpu: 0.0.40
codegen_flags: <defaults>
</compile_context>

<pallas_src>
import jax
import jax.numpy as jnp
from jax.experimental import pallas as pl
from jax.experimental.pallas import tpu as pltpu

IN_FEATURES = 250 * 2 * 2   # 1000 (kept unpadded; sublane-divisible)
HIDDEN = 350
N_CLASSES = 43

# Lane-aligned (multiple-of-128) padded dims for the small matrices.
HID_PAD = 384
OUT_PAD = 128


def _round_up(x, m):
    return (x + m - 1) // m * m


def _cdiv(a, b):
    return -(-a // b)


def classifier_kernel(x_ref, w1_ref, b1_ref, w2_ref, b2_ref, out_ref):
    # fc1: bf16 x bf16 MXU matmul, f32 accumulation; epilogue stays f32.
    h = jnp.dot(x_ref[...], w1_ref[...], preferred_element_type=jnp.float32)
    h = jnp.maximum(h + b1_ref[...], 0.0)          # (TB, 384) f32
    # F.dropout(x, training=self.training): inference mode -> identity.
    # TODO(synk): training-mode dropout (pltpu.prng_random_bits mask + 1/(1-p)
    # scaling) not wired in.
    # fc2 (output padded to 128 lanes -> unmasked lane-dense stores).
    y = jnp.dot(h.astype(jnp.bfloat16), w2_ref[...],
                preferred_element_type=jnp.float32)
    out_ref[...] = (y + b2_ref[...]).astype(out_ref.dtype)


def prepare_params(w1, b1, w2, b2):
    """Pre-transpose, zero-pad small dims to lane multiples, cast to bf16.

    w1: (350, 1000), b1: (350,), w2: (43, 350), b2: (43,)  (PyTorch layout).
    Returns W1^T (1000, 384) bf16, b1 (1, 384) f32, W2^T (384, 128) bf16,
    b2 (1, 128) f32.  Padded rows/cols are exact zeros.
    """
    w1_t = jnp.zeros((IN_FEATURES, HID_PAD), jnp.float32)
    w1_t = w1_t.at[:, :HIDDEN].set(jnp.transpose(w1))
    w2_t = jnp.zeros((HID_PAD, OUT_PAD), jnp.float32)
    w2_t = w2_t.at[:HIDDEN, :N_CLASSES].set(jnp.transpose(w2))
    b1_p = jnp.zeros((1, HID_PAD), jnp.float32).at[0, :HIDDEN].set(b1)
    b2_p = jnp.zeros((1, OUT_PAD), jnp.float32).at[0, :N_CLASSES].set(b2)
    return (w1_t.astype(jnp.bfloat16), b1_p,
            w2_t.astype(jnp.bfloat16), b2_p)


def classifier_forward(x, w1_t, b1, w2_t, b2, *, tb=1024):
    """x: (B, 1000) f32 or bf16; w1_t: (1000, 384) bf16; b1: (1, 384) f32;
       w2_t: (384, 128) bf16; b2: (1, 128) f32.  Returns (B, 43) f32."""
    B = x.shape[0]

    # Balanced batch tiling: never waste more than ~16*num_tiles padded rows.
    # 16-row alignment keeps bf16 sublane packing clean on every generation.
    b_min = _round_up(max(B, 16), 16)
    num_tiles = max(1, _cdiv(b_min, tb))
    TB = _round_up(_cdiv(b_min, num_tiles), 16)
    b_pad = TB * num_tiles

    # Fuse (optional) batch pad with the bf16 cast: at most one half-width
    # copy of x is written; zero copies if x is already aligned bf16.
    x_bf = x if x.dtype == jnp.bfloat16 else x.astype(jnp.bfloat16)
    if b_pad != B:
        x_bf = jnp.pad(x_bf, ((0, b_pad - B), (0, 0)))

    flops = 2 * b_pad * (IN_FEATURES * HID_PAD + HID_PAD * OUT_PAD)
    bytes_accessed = (b_pad * IN_FEATURES * 2            # x bf16 stream
                      + w1_t.size * 2 + w2_t.size * 2    # resident weights
                      + b1.size * 4 + b2.size * 4
                      + b_pad * OUT_PAD * 4)              # lane-dense f32 out

    out = pl.pallas_call(
        classifier_kernel,
        out_shape=jax.ShapeDtypeStruct((b_pad, OUT_PAD), jnp.float32),
        grid_spec=pltpu.PrefetchScalarGridSpec(
            num_scalar_prefetch=0,
            grid=(num_tiles,),
            in_specs=[
                pl.BlockSpec((TB, IN_FEATURES), lambda i: (i, 0)),      # x (streamed bf16)
                pl.BlockSpec((IN_FEATURES, HID_PAD), lambda i: (0, 0)),  # W1^T (resident)
                pl.BlockSpec((1, HID_PAD), lambda i: (0, 0)),            # b1   (resident)
                pl.BlockSpec((HID_PAD, OUT_PAD), lambda i: (0, 0)),      # W2^T (resident)
                pl.BlockSpec((1, OUT_PAD), lambda i: (0, 0)),            # b2   (resident)
            ],
            out_specs=pl.BlockSpec((TB, OUT_PAD), lambda i: (i, 0)),
        ),
        compiler_params=pltpu.CompilerParams(
            # "parallel" lets the runtime shard independent batch tiles across
            # TensorCores (v7x); a single-tile grid stays "arbitrary".
            dimension_semantics=(("parallel",) if num_tiles > 1
                                 else ("arbitrary",)),
        ),
        cost_estimate=pl.CostEstimate(
            flops=flops, transcendentals=0, bytes_accessed=bytes_accessed),
    )(x_bf, w1_t, b1, w2_t, b2)

    return out[:B, :N_CLASSES]


def init_linear_params(key, in_features, out_features):
    """PyTorch nn.Linear default init: U(-1/sqrt(fan_in), 1/sqrt(fan_in))."""
    kw, kb = jax.random.split(key)
    bound = 1.0 / jnp.sqrt(jnp.float32(in_features))
    w = jax.random.uniform(kw, (out_features, in_features), jnp.float32, -bound, bound)
    b = jax.random.uniform(kb, (out_features,), jnp.float32, -bound, bound)
    return w, b


if __name__ == "__main__":
    key = jax.random.PRNGKey(0)
    k_x, k_fc1, k_fc2 = jax.random.split(key, 3)

    B = 8  # small batch
    x = jax.random.normal(k_x, (B, IN_FEATURES), jnp.float32)

    w1, b1 = init_linear_params(k_fc1, IN_FEATURES, HIDDEN)     # (350, 1000), (350,)
    w2, b2 = init_linear_params(k_fc2, HIDDEN, N_CLASSES)       # (43, 350),   (43,)

    w1_t_bf, b1_p, w2_t_bf, b2_p = prepare_params(w1, b1, w2, b2)

    fwd = jax.jit(classifier_forward)
    out = fwd(x, w1_t_bf, b1_p, w2_t_bf, b2_p)
    out = jax.block_until_ready(out)
    assert out.shape == (B, N_CLASSES)

    # Reference 1 (tight): emulate the bf16-weight / bf16-x / f32-accumulate
    # math in plain JAX.
    xb = x.astype(jnp.bfloat16).astype(jnp.float32)
    w1_ref = w1_t_bf[:, :HIDDEN].astype(jnp.float32)
    w2_ref = w2_t_bf[:HIDDEN, :N_CLASSES].astype(jnp.float32)
    h_ref = jnp.maximum(xb @ w1_ref + b1, 0.0)
    hb = h_ref.astype(jnp.bfloat16).astype(jnp.float32)
    ref_bf16 = hb @ w2_ref + b2
    assert jnp.allclose(out, ref_bf16, atol=3e-3, rtol=3e-3), (
        float(jnp.max(jnp.abs(out - ref_bf16))))

    # Reference 2 (loose): full f32 math of the original module (eval-mode dropout).
    ref_f32 = jnp.maximum(x @ w1.T + b1, 0.0) @ w2.T + b2
    assert jnp.allclose(out, ref_f32, atol=5e-2, rtol=5e-2), (
        float(jnp.max(jnp.abs(out - ref_f32))))

    print("KERNEL_OK")
</pallas_src>

<mosaic_0001>
module attributes {stable_mosaic.version = 11 : i64} {
  func.func @classifier_kernel(%arg0: i32, %arg1: memref<16x1000xbf16, #tpu.memory_space<vmem>>, %arg2: memref<1000x384xbf16, #tpu.memory_space<vmem>>, %arg3: memref<1x384xf32, #tpu.memory_space<vmem>>, %arg4: memref<384x128xbf16, #tpu.memory_space<vmem>>, %arg5: memref<1x128xf32, #tpu.memory_space<vmem>>, %arg6: memref<16x128xf32, #tpu.memory_space<vmem>>) attributes {dimension_semantics = [#tpu.dimension_semantics<arbitrary>], iteration_bounds = array<i64: 1>, scalar_prefetch = 0 : i64, scratch_operands = 0 : i64, tpu.core_type = #tpu.core_type<tc>, window_params = [{transform_indices = @transform_0, window_bounds = array<i64: 16, 1000>}, {pipeline_mode = #tpu.pipeline_mode<synchronous>, transform_indices = @transform_1, window_bounds = array<i64: 1000, 384>}, {pipeline_mode = #tpu.pipeline_mode<synchronous>, transform_indices = @transform_2, window_bounds = array<i64: 1, 384>}, {pipeline_mode = #tpu.pipeline_mode<synchronous>, transform_indices = @transform_3, window_bounds = array<i64: 384, 128>}, {pipeline_mode = #tpu.pipeline_mode<synchronous>, transform_indices = @transform_4, window_bounds = array<i64: 1, 128>}, {transform_indices = @transform_5, window_bounds = array<i64: 16, 128>}]} {
    %c0 = arith.constant 0 : index
    %c0_0 = arith.constant 0 : index
    %0 = vector.load %arg1[%c0, %c0_0] : memref<16x1000xbf16, #tpu.memory_space<vmem>>, vector<16x1000xbf16>
    %c0_1 = arith.constant 0 : index
    %c0_2 = arith.constant 0 : index
    %1 = vector.load %arg2[%c0_1, %c0_2] : memref<1000x384xbf16, #tpu.memory_space<vmem>>, vector<1000x384xbf16>
    %cst = arith.constant dense<0.000000e+00> : vector<16x384xf32>
    %2 = tpu.matmul %0, %1, %cst {dimension_numbers = #tpu.dot_dimension_numbers<[1], [0], [0], [1], [0, 0, 1, 1], [], []>} : vector<16x1000xbf16>, vector<1000x384xbf16>, vector<16x384xf32> -> vector<16x384xf32>
    %c0_3 = arith.constant 0 : index
    %c0_4 = arith.constant 0 : index
    %3 = vector.load %arg3[%c0_3, %c0_4] : memref<1x384xf32, #tpu.memory_space<vmem>>, vector<1x384xf32>
    %4 = vector.broadcast %3 : vector<1x384xf32> to vector<16x384xf32>
    %5 = arith.addf %2, %4 : vector<16x384xf32>
    %cst_5 = arith.constant 0.000000e+00 : f32
    %6 = vector.broadcast %cst_5 : f32 to vector<16x384xf32>
    %7 = arith.maximumf %5, %6 : vector<16x384xf32>
    %8 = arith.truncf %7 : vector<16x384xf32> to vector<16x384xbf16>
    %c0_6 = arith.constant 0 : index
    %c0_7 = arith.constant 0 : index
    %9 = vector.load %arg4[%c0_6, %c0_7] : memref<384x128xbf16, #tpu.memory_space<vmem>>, vector<384x128xbf16>
    %cst_8 = arith.constant dense<0.000000e+00> : vector<16x128xf32>
    %10 = tpu.matmul %8, %9, %cst_8 {dimension_numbers = #tpu.dot_dimension_numbers<[1], [0], [0], [1], [0, 0, 1, 1], [], []>} : vector<16x384xbf16>, vector<384x128xbf16>, vector<16x128xf32> -> vector<16x128xf32>
    %c0_9 = arith.constant 0 : index
    %c0_10 = arith.constant 0 : index
    %11 = vector.load %arg5[%c0_9, %c0_10] : memref<1x128xf32, #tpu.memory_space<vmem>>, vector<1x128xf32>
    %12 = vector.broadcast %11 : vector<1x128xf32> to vector<16x128xf32>
    %13 = arith.addf %10, %12 : vector<16x128xf32>
    %c0_11 = arith.constant 0 : index
    %c0_12 = arith.constant 0 : index
    %14 = vector.load %arg6[%c0_11, %c0_12] : memref<16x128xf32, #tpu.memory_space<vmem>>, vector<16x128xf32>
    tpu.vector_store %arg6[%c0_11, %c0_12], %13 {strides = array<i32>} : memref<16x128xf32, #tpu.memory_space<vmem>>, vector<16x128xf32>,
    return
  }
  func.func @transform_0(%arg0: i32) -> (i32, i32) {
    %c0_i32 = arith.constant 0 : i32
    %c0_i32_0 = arith.constant 0 : i32
    return %arg0, %c0_i32 : i32, i32
  }
  func.func @transform_1(%arg0: i32) -> (i32, i32) {
    %c0_i32 = arith.constant 0 : i32
    %c0_i32_0 = arith.constant 0 : i32
    %c0_i32_1 = arith.constant 0 : i32
    return %c0_i32, %c0_i32_0 : i32, i32
  }
  func.func @transform_2(%arg0: i32) -> (i32, i32) {
    %c0_i32 = arith.constant 0 : i32
    %c0_i32_0 = arith.constant 0 : i32
    %c0_i32_1 = arith.constant 0 : i32
    return %c0_i32, %c0_i32_0 : i32, i32
  }
  func.func @transform_3(%arg0: i32) -> (i32, i32) {
    %c0_i32 = arith.constant 0 : i32
    %c0_i32_0 = arith.constant 0 : i32
    %c0_i32_1 = arith.constant 0 : i32
    return %c0_i32, %c0_i32_0 : i32, i32
  }
  func.func @transform_4(%arg0: i32) -> (i32, i32) {
    %c0_i32 = arith.constant 0 : i32
    %c0_i32_0 = arith.constant 0 : i32
    %c0_i32_1 = arith.constant 0 : i32
    return %c0_i32, %c0_i32_0 : i32, i32
  }
  func.func @transform_5(%arg0: i32) -> (i32, i32) {
    %c0_i32 = arith.constant 0 : i32
    %c0_i32_0 = arith.constant 0 : i32
    return %arg0, %c0_i32 : i32, i32
  }
}

</mosaic_0001>

<bundles_post_ra>
// kernel: classifier_forward.1
= control target key start
LH: loop header
LB: loop body
LE: loop exit
PB: predicated region body
PF: predicated region fallthrough
CT: control target
= control target key end

     0   :  { %10 = vsyncpa [#allocation3], 0  ;;  %s2659_s18 = smov [#allocation2]   ;;  %s2867_s0 = inlined_call_operand.vmem [shape: bf16[16,1000], index: 0, kind: input, shape index: {}]   ;;  %s2868_s1 = inlined_call_operand.hbm [shape: bf16[1000,384], index: 1, kind: input, shape index: {}]   ;;  %s2869_s2 = inlined_call_operand.vmem [shape: f32[1,384], index: 2, kind: input, shape index: {}]   ;;  %s2870_s3 = inlined_call_operand.vmem [shape: bf16[384,128], index: 3, kind: input, shape index: {}]   ;;  %s2871_s4 = inlined_call_operand.vmem [shape: f32[1,128], index: 4, kind: input, shape index: {}]   ;;  %s2872_s5 = inlined_call_operand.vmem [shape: f32[16,128], index: 5, kind: output, shape index: {}]  }
   0x1   :  { %s18_s19 = sshll.u32 %s2659_s18, 4  ;;  %s2635_s22 = scalar_lea.hbm %s2868_s1, 24000  ;;  %s19_s19 = int_to_ptr.vmem [resolvable:$true] %s18_s19 }
   0x2   :  { %p2636_p0 = scmp.ne.s32.totalorder %s2868_s1, %s2635_s22  ;;  %p2639_p1 = scmp.lt.u32.totalorder %s2635_s22, %s2868_s1 }
   0x4   :  { %p2641_p2 = pnand %p2639_p1, %p2636_p0 }
   0x6   :  { %2644 = shalt.err (!%p2641_p2)
}
   0x7   :  { %s2645_s27 = scalar_lea.vmem %s19_s19, 24000  ;;  %p2650_p4 = scmp.lt.s32.totalorder %s19_s19, %s19_s19 }
   0x8   :  { %p2646_p3 = scmp.ne.s32.totalorder %s19_s19, %s2645_s27  ;;  %p2651_p5 = scmp.lt.s32.totalorder %s2645_s27, %s2645_s27 }
   0xa   :  { %p2652_p6 = por %p2651_p5, %p2650_p4 }
   0xc   :  { %p2653_p7 = pnand %p2652_p6, %p2646_p3 }
   0xe   :  { %2656 = shalt.err (!%p2653_p7)
}
   0xf   :  { %s2660_s28 = smov 192   ;;  %s2661_s29 = smov 12  }
  0x10   :  { %24 = dma.hbm_to_vmem [thread:$0]  %s2868_s1, 24000, %s19_s19, [#allocation3], %s2660_s28, %s2660_s28, %s2661_s29  }
  0x11   :  { %2657 = dma.done.wait [#allocation3], 24000  }
  0x12   :  { %2658 = vsyncadd [#allocation3], 4294943296  ;;  %v2360_v0 = vld [vmem:[#allocation2 + $0x4] ss:$12 sps:$4 sm:$0xff]   ;;  %v2362_v1 = vld [vmem:[#allocation2] ss:$12 sps:$4 sm:$0xff]  }
  0x13   :  { %1363 = vmatprep.subr.bf16.mxu0 %v2360_v0  ;;  %v2363_v2 = vld [vmem:[#allocation2 + $0x1c] ss:$12 sps:$4 sm:$0xff]   ;;  %v2365_v3 = vld [vmem:[#allocation2 + $0x18] ss:$12 sps:$4 sm:$0xff]   ;;  %v2366_v4 = vld [vmem:[#allocation2 + $0x34] ss:$12 sps:$4 sm:$0xff]  }
  0x14   :  { %1364 = vmatpush1.bf16.msra.mxu0 %v2362_v1  ;;  %v2371_v5 = vld [vmem:[#allocation2 + $0xc8] ss:$12 sps:$4 sm:$0xff]   ;;  %v2368_v6 = vld [vmem:[#allocation2 + $0x30] ss:$12 sps:$4 sm:$0xff]   ;;  %v2369_v8 = vld [vmem:[#allocation2 + $0x4c] ss:$12 sps:$4 sm:$0xff]  }
  0x15   :  { %1365 = vmatprep.subr.bf16.mxu0 %v2363_v2  ;;  %2221 = vmatprep.subr.bf16.mxu1 %v2371_v5  ;;  %v2373_v7 = vld [vmem:[#allocation2 + $0x8] ss:$12 sps:$4 sm:$0xff]   ;;  %v2376_v9 = vld [vmem:[#allocation2 + $0xe0] ss:$12 sps:$4 sm:$0xff]   ;;  %v2374_v12 = vld [vmem:[#allocation2 + $0x64] ss:$12 sps:$4 sm:$0xff]  }
  0x16   :  { %2222 = vmatpush3.bf16.msra.mxu1 %v2373_v7  ;;  %v2378_v10 = vld [vmem:[#allocation2 + $0x20] ss:$12 sps:$4 sm:$0xff]   ;;  %v2372_v11 = vld [vmem:[#allocation2 + $0x48] ss:$12 sps:$4 sm:$0xff]   ;;  %v2381_v13 = vld [vmem:[#allocation2 + $0xf8] ss:$12 sps:$4 sm:$0xff]  }
  0x17   :  { %2223 = vmatprep.subr.bf16.mxu1 %v2376_v9  ;;  %v2383_v14 = vld [vmem:[#allocation2 + $0x38] ss:$12 sps:$4 sm:$0xff]   ;;  %v2377_v15 = vld [vmem:[#allocation2 + $0x60] ss:$12 sps:$4 sm:$0xff]   ;;  %v2386_v16 = vld [vmem:[#allocation2 + $0x110] ss:$12 sps:$4 sm:$0xff]  }
  0x18   :  { %1366 = vmatpush1.bf16.msra.mxu0 %v2365_v3  ;;  %v2379_v17 = vld [vmem:[#allocation2 + $0x7c] ss:$12 sps:$4 sm:$0xff]   ;;  %v2382_v19 = vld [vmem:[#allocation2 + $0x78] ss:$12 sps:$4 sm:$0xff]   ;;  %v2384_v21 = vld [vmem:[#allocation2 + $0x94] ss:$12 sps:$4 sm:$0xff]  }
  0x19   :  { %1367 = vmatprep.subr.bf16.mxu0 %v2366_v4  ;;  %v2388_v18 = vld [vmem:[#allocation2 + $0x50] ss:$12 sps:$4 sm:$0xff]   ;;  %v2391_v20 = vld [vmem:[#allocation2 + $0x128] ss:$12 sps:$4 sm:$0xff]   ;;  %v2396_v23 = vld [vmem:[#allocation2 + $0x140] ss:$12 sps:$4 sm:$0xff]  }
  0x1a   :  { %2224 = vmatpush3.bf16.msra.mxu1 %v2378_v10  ;;  %v2393_v22 = vld [vmem:[#allocation2 + $0x68] ss:$12 sps:$4 sm:$0xff]   ;;  %v2387_v24 = vld [vmem:[#allocation2 + $0x90] ss:$12 sps:$4 sm:$0xff]   ;;  %v2389_v25 = vld [vmem:[#allocation2 + $0xac] ss:$12 sps:$4 sm:$0xff]  }
  0x1b   :  { %2225 = vmatprep.subr.bf16.mxu1 %v2381_v13  ;;  %v2398_v26 = vld [vmem:[#allocation2 + $0x80] ss:$12 sps:$4 sm:$0xff]   ;;  %v2401_v27 = vld [vmem:[#allocation2 + $0x158] ss:$12 sps:$4 sm:$0xff]   ;;  %v2392_v28 = vld [vmem:[#allocation2 + $0xa8] ss:$12 sps:$4 sm:$0xff]  }
  0x1c   :  { %1368 = vmatpush1.bf16.msra.mxu0 %v2368_v6  ;;  %v2394_v29 = vld [vmem:[#allocation2 + $0xc4] ss:$12 sps:$4 sm:$0xff]   ;;  %v2397_v30 = vld [vmem:[#allocation2 + $0xc0] ss:$12 sps:$4 sm:$0xff]   ;;  %v2399_v33 = vld [vmem:[#allocation2 + $0xdc] ss:$12 sps:$4 sm:$0xff]  }
  0x1d   :  { %1369 = vmatprep.subr.bf16.mxu0 %v2369_v8  ;;  %v2403_v31 = vld [vmem:[#allocation2 + $0x98] ss:$12 sps:$4 sm:$0xff]   ;;  %v2406_v32 = vld [vmem:[#allocation2 + $0x170] ss:$12 sps:$4 sm:$0xff]   ;;  %v2411_v38 = vld [vmem:[#allocation2 + $0x248] ss:$12 sps:$4 sm:$0xff]  }
  0x1e   :  { %2226 = vmatpush3.bf16.msra.mxu1 %v2383_v14  ;;  %v35_v34 = vld [vmem:[%s2867_s0] sm:$0xff]  ;;  %v2408_v36 = vld [vmem:[#allocation2 + $0xb0] ss:$12 sps:$4 sm:$0xff]   ;;  %v2413_v42 = vld [vmem:[#allocation2 + $0x188] ss:$12 sps:$4 sm:$0xff]   ;;  %vm1349_vm0 = vcmask 850944  }
  0x1f   :  { %2227 = vmatprep.subr.bf16.mxu1 %v2386_v16  ;;  %v39_v35 = vld [vmem:[%s2867_s0 + $0x20] sm:$0xff]  ;;  %v2407_v44 = vld [vmem:[#allocation2 + $0xf0] ss:$12 sps:$4 sm:$0xff]   ;;  %v2409_v45 = vld [vmem:[#allocation2 + $0x10c] ss:$12 sps:$4 sm:$0xff]   ;;  %vm1353_vm1 = vcmask 1043456  }
  0x20   :  { %1370 = vmatpush1.bf16.msra.mxu0 %v2372_v11  ;;  %v1997_v37 = vcombine.high %v35_v34, %v39_v35  ;;  %v2402_v39 = vld [vmem:[#allocation2 + $0xd8] ss:$12 sps:$4 sm:$0xff]   ;;  %v2404_v40 = vld [vmem:[#allocation2 + $0xf4] ss:$12 sps:$4 sm:$0xff]   ;;  %v2713_v41 = vcombine.low %v35_v34, %v39_v35  ;;  %v2426_v51 = vld [vmem:[#allocation2 + $0x290] ss:$12 sps:$4 sm:$0xff]  }
  0x21   :  { %1371 = vmatprep.subr.bf16.mxu0 %v2374_v12  ;;  %v2416_v43 = vld [vmem:[#allocation2 + $0x260] ss:$12 sps:$4 sm:$0xff]   ;;  %v2421_v47 = vld [vmem:[#allocation2 + $0x278] ss:$12 sps:$4 sm:$0xff]   ;;  %v2412_v48 = vld [vmem:[#allocation2 + $0x108] ss:$12 sps:$4 sm:$0xff]  }
  0x22   :  { %2228 = vmatpush3.bf16.msra.mxu1 %v2388_v18  ;;  %1567 = vmatprep.mubr.bf16.mxu1 %v1997_v37  ;;  %v2418_v46 = vld [vmem:[#allocation2 + $0x1a0] ss:$12 sps:$4 sm:$0xff]   ;;  %v2414_v49 = vld [vmem:[#allocation2 + $0x124] ss:$12 sps:$4 sm:$0xff]   ;;  %v2419_v53 = vld [vmem:[#allocation2 + $0x13c] ss:$12 sps:$4 sm:$0xff]  }
  0x23   :  { %2229 = vmatprep.subr.bf16.mxu1 %v2391_v20  ;;  %1395 = vmatprep.mubr.bf16.mxu0 %v1997_v37  ;;  %v2423_v50 = vld [vmem:[#allocation2 + $0x1b8] ss:$12 sps:$4 sm:$0xff]   ;;  %v2417_v52 = vld [vmem:[#allocation2 + $0x120] ss:$12 sps:$4 sm:$0xff]   ;;  %v2428_v54 = vld [vmem:[#allocation2 + $0x1d0] ss:$12 sps:$4 sm:$0xff]  }
  0x24   :  { %1372 = vmatpush1.bf16.msra.mxu0 %v2377_v15  ;;  %v2431_v55 = vld [vmem:[#allocation2 + $0x2a8] ss:$12 sps:$4 sm:$0xff]   ;;  %v2422_v56 = vld [vmem:[#allocation2 + $0x138] ss:$12 sps:$4 sm:$0xff]   ;;  %v2437_v59 = vld [vmem:[#allocation2 + $0x2c0] ss:$12 sps:$4 sm:$0xff]  }
  0x25   :  { %1373 = vmatprep.subr.bf16.mxu0 %v2379_v17  ;;  %v2424_v57 = vld [vmem:[#allocation2 + $0x154] ss:$12 sps:$4 sm:$0xff]   ;;  %v2427_v60 = vld [vmem:[#allocation2 + $0x150] ss:$12 sps:$4 sm:$0xff]   ;;  %v2429_v61 = vld [vmem:[#allocation2 + $0x16c] ss:$12 sps:$4 sm:$0xff]  }
  0x26   :  { %2230 = vmatpush3.bf16.msra.mxu1 %v2393_v22  ;;  %v2433_v58 = vld [vmem:[#allocation2 + $0x1e8] ss:$12 sps:$4 sm:$0xff]   ;;  %v2438_v62 = vld [vmem:[#allocation2 + $0x200] ss:$12 sps:$4 sm:$0xff]   ;;  %v2442_v63 = vld [vmem:[#allocation2 + $0x2d8] ss:$12 sps:$4 sm:$0xff]  }
  0x27   :  { %2231 = vmatprep.subr.bf16.mxu1 %v2396_v23  ;;  %v2432_v0 = vld [vmem:[#allocation2 + $0x168] ss:$12 sps:$4 sm:$0xff]   ;;  %v2436_v3 = vld [vmem:[#allocation2 + $0x184] ss:$12 sps:$4 sm:$0xff]   ;;  %v2434_v7 = vld [vmem:[#allocation2 + $0x180] ss:$12 sps:$4 sm:$0xff]  }
  0x28   :  { %1374 = vmatpush1.bf16.msra.mxu0 %v2382_v19  ;;  %v36_v1 = vld [vmem:[%s2867_s0 + $0x8] sm:$0xff]  ;;  %v2443_v5 = vld [vmem:[#allocation2 + $0x218] ss:$12 sps:$4 sm:$0xff]   ;;  %v2447_v6 = vld [vmem:[#allocation2 + $0x2f0] ss:$12 sps:$4 sm:$0xff]   ;;  %vm2664_vm2 = vmmov 0  }
  0x29   :  { %1375 = vmatprep.subr.bf16.mxu0 %v2384_v21  ;;  %v40_v2 = vld [vmem:[%s2867_s0 + $0x28] sm:$0xff]  ;;  %v2448_v9 = vld [vmem:[#allocation2 + $0x230] ss:$12 sps:$4 sm:$0xff]   ;;  %v2439_v11 = vld [vmem:[#allocation2 + $0x198] ss:$12 sps:$4 sm:$0xff]  }
  0x2a   :  { %2232 = vmatpush3.bf16.msra.mxu1 %v2398_v26  ;;  %v1999_v4 = vcombine.high %v36_v1, %v40_v2  ;;  %v2441_v8 = vld [vmem:[#allocation2 + $0x19c] ss:$12 sps:$4 sm:$0xff]   ;;  %v2446_v12 = vld [vmem:[#allocation2 + $0x1b4] ss:$12 sps:$4 sm:$0xff]   ;;  %v2723_v13 = vcombine.low %v36_v1, %v40_v2  ;;  %v2451_v17 = vld [vmem:[#allocation2 + $0x1cc] ss:$12 sps:$4 sm:$0xff]  }
  0x2b   :  { %2233 = vmatprep.subr.bf16.mxu1 %v2401_v27  ;;  %v2452_v10 = vld [vmem:[#allocation2 + $0x3c8] ss:$12 sps:$4 sm:$0xff]   ;;  %v2457_v15 = vld [vmem:[#allocation2 + $0x3e0] ss:$12 sps:$4 sm:$0xff]   ;;  %v2444_v16 = vld [vmem:[#allocation2 + $0x1b0] ss:$12 sps:$4 sm:$0xff]  }
  0x2c   :  { %1376 = vmatpush1.bf16.msra.mxu0 %v2387_v24  ;;  %v2453_v14 = vld [vmem:[#allocation2 + $0x308] ss:$12 sps:$4 sm:$0xff]   ;;  %v2458_v18 = vld [vmem:[#allocation2 + $0x320] ss:$12 sps:$4 sm:$0xff]   ;;  %v2462_v19 = vld [vmem:[#allocation2 + $0x3f8] ss:$12 sps:$4 sm:$0xff]  }
  0x2d   :  { %1377 = vmatprep.subr.bf16.mxu0 %v2389_v25  ;;  %v2449_v20 = vld [vmem:[#allocation2 + $0x1c8] ss:$12 sps:$4 sm:$0xff]   ;;  %v2456_v21 = vld [vmem:[#allocation2 + $0x1e4] ss:$12 sps:$4 sm:$0xff]   ;;  %v2454_v24 = vld [vmem:[#allocation2 + $0x1e0] ss:$12 sps:$4 sm:$0xff]  }
  0x2e   :  { %2234 = vmatpush3.bf16.msra.mxu1 %v2403_v31  ;;  %v2463_v22 = vld [vmem:[#allocation2 + $0x338] ss:$12 sps:$4 sm:$0xff]   ;;  %v2467_v23 = vld [vmem:[#allocation2 + $0x410] ss:$12 sps:$4 sm:$0xff]   ;;  %v2472_v27 = vld [vmem:[#allocation2 + $0x428] ss:$12 sps:$4 sm:$0xff]  }
  0x2f   :  { %2235 = vmatprep.subr.bf16.mxu1 %v2406_v32  ;;  %v2461_v25 = vld [vmem:[#allocation2 + $0x1fc] ss:$12 sps:$4 sm:$0xff]   ;;  %v2477_v32 = vld [vmem:[#allocation2 + $0x440] ss:$12 sps:$4 sm:$0xff]   ;;  %v41_v34 = vld [vmem:[%s2867_s0 + $0x30] sm:$0xff] }
  0x30   :  { %1378 = vmatpush1.bf16.msra.mxu0 %v2392_v28  ;;  %v2468_v26 = vld [vmem:[#allocation2 + $0x350] ss:$12 sps:$4 sm:$0xff]   ;;  %v2459_v28 = vld [vmem:[#allocation2 + $0x1f8] ss:$12 sps:$4 sm:$0xff]   ;;  %v2478_v37 = vld [vmem:[#allocation2 + $0x380] ss:$12 sps:$4 sm:$0xff]  }
  0x31   :  { %1379 = vmatprep.subr.bf16.mxu0 %v2394_v29  ;;  %v2466_v29 = vld [vmem:[#allocation2 + $0x214] ss:$12 sps:$4 sm:$0xff]   ;;  %v2464_v31 = vld [vmem:[#allocation2 + $0x210] ss:$12 sps:$4 sm:$0xff]   ;;  %v2471_v35 = vld [vmem:[#allocation2 + $0x22c] ss:$12 sps:$4 sm:$0xff]  }
  0x32   :  { %2236 = vmatpush3.bf16.msra.mxu1 %v2408_v36  ;;  %v2512_v1 = vld [vmem:[#allocation2 + $0x500] ss:$12 sps:$4 sm:$0xff]   ;;  %v2746_v2 = vld [vmem:[%s2867_s0 + $0x18] sm:$0xff] }
  0x33   :  { %2243 = vmatprep.subr.bf16.mxu1 %v2411_v38  ;;  %v2482_v38 = vld [vmem:[#allocation2 + $0x458] ss:$12 sps:$4 sm:$0xff]  }
  0x34   :  { %1380 = vmatpush1.bf16.msra.mxu0 %v2397_v30  ;;  %v2473_v30 = vld [vmem:[#allocation2 + $0x368] ss:$12 sps:$4 sm:$0xff]  }
  0x35   :  { %1381 = vmatprep.subr.bf16.mxu0 %v2399_v33  ;;  %1568 = vmatmul.mubr.bf16.vlgmr.msra.gmra.mrb[0].mxu1 %v2713_v41  ;;  %v37_v33 = vld [vmem:[%s2867_s0 + $0x10] sm:$0xff] }
  0x36   :  { %2244 = vmatpush3.bf16.msra.mxu1 %v2413_v42  ;;  %1608 = vmatprep.mubr.bf16.mxu1 %v1999_v4  ;;  %v2732_v36 = vcombine.high %v37_v33, %v41_v34  ;;  %v2487_v42 = vld [vmem:[#allocation2 + $0x470] ss:$12 sps:$4 sm:$0xff]  }
  0x37   :  { %2245 = vmatprep.subr.bf16.mxu1 %v2416_v43  ;;  %v2474_v43 = vld [vmem:[#allocation2 + $0x240] ss:$12 sps:$4 sm:$0xff]  }
  0x38   :  { %1382 = vmatpush1.bf16.msra.mxu0 %v2402_v39  ;;  %v2469_v39 = vld [vmem:[#allocation2 + $0x228] ss:$12 sps:$4 sm:$0xff]  }
  0x39   :  { %1383 = vmatprep.subr.bf16.mxu0 %v2404_v40  ;;  %v2476_v40 = vld [vmem:[#allocation2 + $0x244] ss:$12 sps:$4 sm:$0xff]  }
  0x3a   :  { %2246 = vmatpush3.bf16.msra.mxu1 %v2418_v46  ;;  %v2479_v46 = vld [vmem:[#allocation2 + $0x258] ss:$12 sps:$4 sm:$0xff]  }
  0x3b   :  { %2247 = vmatprep.subr.bf16.mxu1 %v2421_v47  ;;  %v2486_v47 = vld [vmem:[#allocation2 + $0x274] ss:$12 sps:$4 sm:$0xff]  }
  0x3c   :  { %1384 = vmatpush1.bf16.msra.mxu0 %v2407_v44  ;;  %v2481_v44 = vld [vmem:[#allocation2 + $0x25c] ss:$12 sps:$4 sm:$0xff]  }
  0x3d   :  { %1385 = vmatprep.subr.bf16.mxu0 %v2409_v45  ;;  %v2488_v45 = vld [vmem:[#allocation2 + $0x3b0] ss:$12 sps:$4 sm:$0xff]  }
  0x3e   :  { %2248 = vmatpush3.bf16.msra.mxu1 %v2423_v50  ;;  %v2662_v50 = vmov 0  }
  0x3f   :  { %2249 = vmatprep.subr.bf16.mxu1 %v2426_v51  ;;  %v2484_v51 = vld [vmem:[#allocation2 + $0x270] ss:$12 sps:$4 sm:$0xff]  }
  0x40   :  { %1386 = vmatpush1.bf16.msra.mxu0 %v2412_v48  ;;  %v2735_v48 = vcombine.low %v37_v33, %v41_v34  ;;  %v2541_v33 = vld [vmem:[#allocation2 + $0x3c0] ss:$12 sps:$4 sm:$0xff]   ;;  %v2547_v34 = vld [vmem:[#allocation2 + $0x3dc] ss:$12 sps:$4 sm:$0xff]  }
  0x41   :  { %1387 = vmatprep.subr.bf16.mxu0 %v2414_v49  ;;  %v2492_v49 = vld [vmem:[#allocation2 + $0x488] ss:$12 sps:$4 sm:$0xff]  }
  0x42   :  { %2250 = vmatpush3.bf16.msra.mxu1 %v2428_v54  ;;  %v2489_v54 = vld [vmem:[#allocation2 + $0x288] ss:$12 sps:$4 sm:$0xff]  }
  0x43   :  { %2251 = vmatprep.subr.bf16.mxu1 %v2431_v55  ;;  %v2495_v55 = vld [vmem:[#allocation2 + $0x2a4] ss:$12 sps:$4 sm:$0xff]  }
  0x44   :  { %1388 = vmatpush1.bf16.msra.mxu0 %v2417_v52  ;;  %v2491_v52 = vld [vmem:[#allocation2 + $0x28c] ss:$12 sps:$4 sm:$0xff]  }
  0x45   :  { %1389 = vmatprep.subr.bf16.mxu0 %v2419_v53  ;;  %v2496_v53 = vld [vmem:[#allocation2 + $0x4a0] ss:$12 sps:$4 sm:$0xff]  }
  0x46   :  { %2252 = vmatpush3.bf16.msra.mxu1 %v2433_v58  ;;  %v2499_v58 = vld [vmem:[#allocation2 + $0x2bc] ss:$12 sps:$4 sm:$0xff]  }
  0x47   :  { %2253 = vmatprep.subr.bf16.mxu1 %v2437_v59  ;;  %v2504_v59 = vld [vmem:[#allocation2 + $0x4d0] ss:$12 sps:$4 sm:$0xff]  }
  0x48   :  { %1390 = vmatpush1.bf16.msra.mxu0 %v2422_v56  ;;  %v2500_v56 = vld [vmem:[#allocation2 + $0x4b8] ss:$12 sps:$4 sm:$0xff]  }
  0x49   :  { %1391 = vmatprep.subr.bf16.mxu0 %v2424_v57  ;;  %v2493_v57 = vld [vmem:[#allocation2 + $0x2a0] ss:$12 sps:$4 sm:$0xff]  }
  0x4a   :  { %2254 = vmatpush3.bf16.msra.mxu1 %v2438_v62  ;;  %v2508_v62 = vld [vmem:[#allocation2 + $0x4e8] ss:$12 sps:$4 sm:$0xff]  }
  0x4b   :  { %2255 = vmatprep.subr.bf16.mxu1 %v2442_v63  ;;  %v2501_v63 = vld [vmem:[#allocation2 + $0x2d0] ss:$12 sps:$4 sm:$0xff]  }
  0x4c   :  { %1392 = vmatpush1.bf16.msra.mxu0 %v2427_v60  ;;  %v2497_v60 = vld [vmem:[#allocation2 + $0x2b8] ss:$12 sps:$4 sm:$0xff]  }
  0x4d   :  { %1393 = vmatprep.subr.bf16.mxu0 %v2429_v61  ;;  %v2503_v61 = vld [vmem:[#allocation2 + $0x2d4] ss:$12 sps:$4 sm:$0xff]  }
  0x4e   :  { %2256 = vmatpush3.bf16.msra.mxu1 %v2443_v5  ;;  %v2505_v5 = vld [vmem:[#allocation2 + $0x2e8] ss:$12 sps:$4 sm:$0xff]  }
  0x4f   :  { %2257 = vmatprep.subr.bf16.mxu1 %v2447_v6  ;;  %v2511_v6 = vld [vmem:[#allocation2 + $0x304] ss:$12 sps:$4 sm:$0xff]  }
  0x50   :  { %1394 = vmatpush1.bf16.msra.mxu0 %v2432_v0  ;;  %v2507_v0 = vld [vmem:[#allocation2 + $0x2ec] ss:$12 sps:$4 sm:$0xff]  }
  0x51   :  { %1406 = vmatprep.subr.bf16.mxu0 %v2436_v3  ;;  %v2751_v3 = vld [vmem:[%s2867_s0 + $0x38] sm:$0xff] }
  0x52   :  { %2258 = vmatpush3.bf16.msra.mxu1 %v2448_v9  ;;  %v2515_v9 = vld [vmem:[#allocation2 + $0x31c] ss:$12 sps:$4 sm:$0xff]  }
  0x53   :  { %1396 = vmatmul.mubr.bf16.vlgmr.msra.gmra.mrb[0].mxu0 %v2713_v41  ;;  %2265 = vmatprep.subr.bf16.mxu1 %v2452_v10  ;;  %v2483_v41 = vld [vmem:[#allocation2 + $0x398] ss:$12 sps:$4 sm:$0xff]   ;;  %v2520_v10 = vld [vmem:[#allocation2 + $0x530] ss:$12 sps:$4 sm:$0xff]  }
  0x54   :  { %1407 = vmatpush1.bf16.msra.mxu0 %v2434_v7  ;;  %1438 = vmatprep.mubr.bf16.mxu0 %v1999_v4  ;;  %v2756_v4 = vcombine.high %v2746_v2, %v2751_v3  ;;  %v2516_v7 = vld [vmem:[#allocation2 + $0x518] ss:$12 sps:$4 sm:$0xff]  }
  0x55   :  { %1408 = vmatprep.subr.bf16.mxu0 %v2441_v8  ;;  %1609 = vmatmul.mubr.bf16.vlgmr.msra.gmra.mrb[4].mxu1 %v2723_v13  ;;  %v2509_v8 = vld [vmem:[#allocation2 + $0x300] ss:$12 sps:$4 sm:$0xff]  }
  0x56   :  { %2266 = vmatpush3.bf16.msra.mxu1 %v2453_v14  ;;  %1649 = vmatprep.mubr.bf16.mxu1 %v2732_v36  ;;  %v2524_v14 = vld [vmem:[#allocation2 + $0x548] ss:$12 sps:$4 sm:$0xff]  }
  0x57   :  { %2267 = vmatprep.subr.bf16.mxu1 %v2457_v15  ;;  %v2517_v15 = vld [vmem:[#allocation2 + $0x330] ss:$12 sps:$4 sm:$0xff]  }
  0x58   :  { %1409 = vmatpush1.bf16.msra.mxu0 %v2439_v11  ;;  %v2513_v11 = vld [vmem:[#allocation2 + $0x318] ss:$12 sps:$4 sm:$0xff]  }
  0x59   :  { %1410 = vmatprep.subr.bf16.mxu0 %v2446_v12  ;;  %v2519_v12 = vld [vmem:[#allocation2 + $0x334] ss:$12 sps:$4 sm:$0xff]  }
  0x5a   :  { %2268 = vmatpush3.bf16.msra.mxu1 %v2458_v18  ;;  %v2527_v18 = vld [vmem:[#allocation2 + $0x364] ss:$12 sps:$4 sm:$0xff]  }
  0x5b   :  { %2269 = vmatprep.subr.bf16.mxu1 %v2462_v19  ;;  %v2532_v19 = vld [vmem:[#allocation2 + $0x578] ss:$12 sps:$4 sm:$0xff]  }
  0x5c   :  { %1411 = vmatpush1.bf16.msra.mxu0 %v2444_v16  ;;  %v2523_v16 = vld [vmem:[#allocation2 + $0x34c] ss:$12 sps:$4 sm:$0xff]  }
  0x5d   :  { %1412 = vmatprep.subr.bf16.mxu0 %v2451_v17  ;;  %v2528_v17 = vld [vmem:[#allocation2 + $0x560] ss:$12 sps:$4 sm:$0xff]  }
  0x5e   :  { %2270 = vmatpush3.bf16.msra.mxu1 %v2463_v22  ;;  %v2536_v22 = vld [vmem:[#allocation2 + $0x590] ss:$12 sps:$4 sm:$0xff]  }
  0x5f   :  { %2271 = vmatprep.subr.bf16.mxu1 %v2467_v23  ;;  %v2529_v23 = vld [vmem:[#allocation2 + $0x378] ss:$12 sps:$4 sm:$0xff]  }
  0x60   :  { %1413 = vmatpush1.bf16.msra.mxu0 %v2449_v20  ;;  %v2525_v20 = vld [vmem:[#allocation2 + $0x360] ss:$12 sps:$4 sm:$0xff]  }
  0x61   :  { %1414 = vmatprep.subr.bf16.mxu0 %v2456_v21  ;;  %v2531_v21 = vld [vmem:[#allocation2 + $0x37c] ss:$12 sps:$4 sm:$0xff]  }
  0x62   :  { %2272 = vmatpush3.bf16.msra.mxu1 %v2468_v26  ;;  %v2540_v26 = vld [vmem:[#allocation2 + $0x5a8] ss:$12 sps:$4 sm:$0xff]  }
  0x63   :  { %2273 = vmatprep.subr.bf16.mxu1 %v2472_v27  ;;  %v2533_v27 = vld [vmem:[#allocation2 + $0x390] ss:$12 sps:$4 sm:$0xff]  }
  0x64   :  { %1415 = vmatpush1.bf16.msra.mxu0 %v2454_v24  ;;  %v2548_v24 = vld [vmem:[#allocation2 + $0x5d8] ss:$0 sps:$4 sm:$0xff]  }
  0x65   :  { %1416 = vmatprep.subr.bf16.mxu0 %v2461_v25  ;;  %v2535_v25 = vld [vmem:[#allocation2 + $0x394] ss:$12 sps:$4 sm:$0xff]  }
  0x66   :  { %2274 = vmatpush3.bf16.msra.mxu1 %v2473_v30  ;;  %v1361_v30 = vsel %vm1353_vm1, %v2548_v24, 0  ;;  %v2613_v24 = vld [vmem:[%s2870_s3 + $0x48] sm:$0xff]  }
  0x67   :  { %2275 = vmatprep.subr.bf16.mxu1 %v2477_v32  ;;  %v2543_v32 = vld [vmem:[#allocation2 + $0x3c4] ss:$12 sps:$4 sm:$0xff]  }
  0x68   :  { %1417 = vmatpush1.bf16.msra.mxu0 %v2459_v28  ;;  %v2539_v28 = vld [vmem:[#allocation2 + $0x3ac] ss:$12 sps:$4 sm:$0xff]  }
  0x69   :  { %1418 = vmatprep.subr.bf16.mxu0 %v2466_v29  ;;  %v2544_v29 = vld [vmem:[#allocation2 + $0x5c0] ss:$12 sps:$4 sm:$0xff]  }
  0x6a   :  { %2276 = vmatpush3.bf16.msra.mxu1 %v2478_v37  ;;  %v2551_v37 = vld [vmem:[#allocation2 + $0x3f4] ss:$12 sps:$4 sm:$0xff]  }
  0x6b   :  { %2277 = vmatprep.subr.bf16.mxu1 %v2482_v38  ;;  %v2549_v38 = vld [vmem:[#allocation2 + $0x3f0] ss:$12 sps:$4 sm:$0xff]  }
  0x6c   :  { %1419 = vmatpush1.bf16.msra.mxu0 %v2464_v31  ;;  %v2537_v31 = vld [vmem:[#allocation2 + $0x3a8] ss:$12 sps:$4 sm:$0xff]  }
  0x6d   :  { %1420 = vmatprep.subr.bf16.mxu0 %v2471_v35  ;;  %v2774_v35 = vcombine.low %v2746_v2, %v2751_v3  ;;  %v2591_v2 = vld [vmem:[#allocation2 + $0x540] ss:$12 sps:$4 sm:$0xff]   ;;  %v2596_v3 = vld [vmem:[#allocation2 + $0x55c] ss:$12 sps:$4 sm:$0xff]  }
  0x6e   :  { %2278 = vmatpush3.bf16.msra.mxu1 %v2483_v41  ;;  %v2557_v41 = vld [vmem:[#allocation2 + $0x424] ss:$12 sps:$4 sm:$0xff]  }
  0x6f   :  { %2279 = vmatprep.subr.bf16.mxu1 %v2487_v42  ;;  %v2555_v42 = vld [vmem:[#allocation2 + $0x420] ss:$12 sps:$4 sm:$0xff]  }
  0x70   :  { %1421 = vmatpush1.bf16.msra.mxu0 %v2469_v39  ;;  %v2554_v39 = vld [vmem:[#allocation2 + $0x40c] ss:$12 sps:$4 sm:$0xff]  }
  0x71   :  { %1422 = vmatprep.subr.bf16.mxu0 %v2476_v40  ;;  %v2552_v40 = vld [vmem:[#allocation2 + $0x408] ss:$12 sps:$4 sm:$0xff]  }
  0x72   :  { %2280 = vmatpush3.bf16.msra.mxu1 %v2488_v45  ;;  %v2563_v45 = vld [vmem:[#allocation2 + $0x454] ss:$12 sps:$4 sm:$0xff]  }
  0x73   :  { %1658 = vmatprep.subr.bf16.mxu1 %v2662_v50 }
  0x74   :  { %1423 = vmatpush1.bf16.msra.mxu0 %v2474_v43  ;;  %v2560_v43 = vld [vmem:[#allocation2 + $0x43c] ss:$12 sps:$4 sm:$0xff]  }
  0x75   :  { %1424 = vmatprep.subr.bf16.mxu0 %v2481_v44  ;;  %1650 = vmatmul.mubr.bf16.vlgmr.msra.gmra.mrb[8].mxu1 %v2735_v48  ;;  %v2558_v44 = vld [vmem:[#allocation2 + $0x438] ss:$12 sps:$4 sm:$0xff]  }
  0x76   :  { %1659 = vmatpush1.bf16.msra.mxu1 %v2492_v49  ;;  %2195 = vmatprep.mubr.msk.bf16.mxu1 %vm1349_vm0, %v2756_v4  ;;  %v2564_v49 = vld [vmem:[#allocation2 + $0x468] ss:$12 sps:$4 sm:$0xff]  }
  0x77   :  { %1660 = vmatprep.subr.bf16.mxu1 %v2662_v50 }
  0x78   :  { %1425 = vmatpush1.bf16.msra.mxu0 %v2479_v46  ;;  %v2561_v46 = vld [vmem:[#allocation2 + $0x450] ss:$12 sps:$4 sm:$0xff]  }
  0x79   :  { %1426 = vmatprep.subr.bf16.mxu0 %v2486_v47  ;;  %v2566_v47 = vld [vmem:[#allocation2 + $0x46c] ss:$12 sps:$4 sm:$0xff]  }
  0x7a   :  { %1661 = vmatpush1.bf16.msra.mxu1 %v2496_v53  ;;  %v2570_v53 = vld [vmem:[#allocation2 + $0x498] ss:$12 sps:$4 sm:$0xff]  }
  0x7b   :  { %1662 = vmatprep.subr.bf16.mxu1 %v2662_v50 }
  0x7c   :  { %1427 = vmatpush1.bf16.msra.mxu0 %v2484_v51  ;;  %v2567_v51 = vld [vmem:[#allocation2 + $0x480] ss:$12 sps:$4 sm:$0xff]  }
  0x7d   :  { %1428 = vmatprep.subr.bf16.mxu0 %v2491_v52  ;;  %v2572_v52 = vld [vmem:[#allocation2 + $0x49c] ss:$12 sps:$4 sm:$0xff]  }
  0x7e   :  { %1663 = vmatpush1.bf16.msra.mxu1 %v2500_v56  ;;  %v2578_v56 = vld [vmem:[#allocation2 + $0x4cc] ss:$12 sps:$4 sm:$0xff]  }
  0x7f   :  { %1664 = vmatprep.subr.bf16.mxu1 %v2662_v50 }
  0x80   :  { %1429 = vmatpush1.bf16.msra.mxu0 %v2489_v54  ;;  %v2575_v54 = vld [vmem:[#allocation2 + $0x4b4] ss:$12 sps:$4 sm:$0xff]  }
  0x81   :  { %1430 = vmatprep.subr.bf16.mxu0 %v2495_v55  ;;  %v2573_v55 = vld [vmem:[#allocation2 + $0x4b0] ss:$12 sps:$4 sm:$0xff]  }
  0x82   :  { %1665 = vmatpush1.bf16.msra.mxu1 %v2504_v59  ;;  %v2579_v59 = vld [vmem:[#allocation2 + $0x4e0] ss:$12 sps:$4 sm:$0xff]  }
  0x83   :  { %1666 = vmatprep.subr.bf16.mxu1 %v2662_v50 }
  0x84   :  { %1431 = vmatpush1.bf16.msra.mxu0 %v2493_v57  ;;  %v2576_v57 = vld [vmem:[#allocation2 + $0x4c8] ss:$12 sps:$4 sm:$0xff]  }
  0x85   :  { %1432 = vmatprep.subr.bf16.mxu0 %v2499_v58  ;;  %v2581_v58 = vld [vmem:[#allocation2 + $0x4e4] ss:$12 sps:$4 sm:$0xff]  }
  0x86   :  { %1667 = vmatpush1.bf16.msra.mxu1 %v2508_v62  ;;  %v2585_v62 = vld [vmem:[#allocation2 + $0x510] ss:$12 sps:$4 sm:$0xff]  }
  0x87   :  { %1668 = vmatprep.subr.bf16.mxu1 %v2662_v50 }
  0x88   :  { %1433 = vmatpush1.bf16.msra.mxu0 %v2497_v60  ;;  %v2584_v60 = vld [vmem:[#allocation2 + $0x4fc] ss:$12 sps:$4 sm:$0xff]  }
  0x89   :  { %1434 = vmatprep.subr.bf16.mxu0 %v2503_v61  ;;  %v2587_v61 = vld [vmem:[#allocation2 + $0x514] ss:$12 sps:$4 sm:$0xff]  }
  0x8a   :  { %1669 = vmatpush1.bf16.msra.mxu1 %v2512_v1  ;;  %v2593_v1 = vld [vmem:[#allocation2 + $0x544] ss:$12 sps:$4 sm:$0xff]  }
  0x8b   :  { %1670 = vmatprep.subr.bf16.mxu1 %v2662_v50 }
  0x8c   :  { %1435 = vmatpush1.bf16.msra.mxu0 %v2501_v63  ;;  %v2590_v63 = vld [vmem:[#allocation2 + $0x52c] ss:$12 sps:$4 sm:$0xff]  }
  0x8d   :  { %1436 = vmatprep.subr.bf16.mxu0 %v2507_v0  ;;  %v2588_v0 = vld [vmem:[#allocation2 + $0x528] ss:$12 sps:$4 sm:$0xff]  }
  0x8e   :  { %1671 = vmatpush1.bf16.msra.mxu1 %v2516_v7  ;;  %v2602_v7 = vld [vmem:[#allocation2 + $0x58c] ss:$12 sps:$4 sm:$0xff]  }
  0x8f   :  { %1672 = vmatprep.subr.bf16.mxu1 %v2662_v50 }
  0x90   :  { %1437 = vmatpush1.bf16.msra.mxu0 %v2505_v5  ;;  %v2599_v5 = vld [vmem:[#allocation2 + $0x574] ss:$12 sps:$4 sm:$0xff]  }
  0x91   :  { %1449 = vmatprep.subr.bf16.mxu0 %v2511_v6  ;;  %v2597_v6 = vld [vmem:[#allocation2 + $0x570] ss:$12 sps:$4 sm:$0xff]  }
  0x92   :  { %1673 = vmatpush1.bf16.msra.mxu1 %v2520_v10  ;;  %v2603_v10 = vld [vmem:[#allocation2 + $0x5a0] ss:$12 sps:$4 sm:$0xff]  }
  0x93   :  { %1439 = vmatmul.mubr.bf16.vlgmr.msra.gmra.mrb[0].mxu0 %v2723_v13  ;;  %1674 = vmatprep.subr.bf16.mxu1 %v2662_v50  ;;  %v2521_v13 = vld [vmem:[#allocation2 + $0x348] ss:$12 sps:$4 sm:$0xff]  }
  0x94   :  { %1450 = vmatpush1.bf16.msra.mxu0 %v2509_v8  ;;  %1481 = vmatprep.mubr.bf16.mxu0 %v2732_v36  ;;  %v2545_v36 = vld [vmem:[#allocation2 + $0x3d8] ss:$12 sps:$4 sm:$0xff]   ;;  %v2600_v8 = vld [vmem:[#allocation2 + $0x588] ss:$12 sps:$4 sm:$0xff]  }
  0x95   :  { %1451 = vmatprep.subr.bf16.mxu0 %v2515_v9  ;;  %v2605_v9 = vld [vmem:[#allocation2 + $0x5a4] ss:$12 sps:$4 sm:$0xff]  }
  0x96   :  { %1675 = vmatpush1.bf16.msra.mxu1 %v2524_v14  ;;  %v2606_v14 = vld [vmem:[#allocation2 + $0x5b8] ss:$12 sps:$4 sm:$0xff]  }
  0x97   :  { %1676 = vmatprep.subr.bf16.mxu1 %v2662_v50 }
  0x98   :  { %1452 = vmatpush1.bf16.msra.mxu0 %v2513_v11  ;;  %v2608_v11 = vld [vmem:[#allocation2 + $0x5bc] ss:$12 sps:$4 sm:$0xff]  }
  0x99   :  { %1453 = vmatprep.subr.bf16.mxu0 %v2519_v12  ;;  %v291_v12 = vld [vmem:[#allocation2 + $0x5d0] sm:$0xff] }
  0x9a   :  { %1677 = vmatpush1.bf16.msra.mxu1 %v2528_v17 }
  0x9b   :  { %1678 = vmatprep.subr.bf16.mxu1 %v2662_v50 }
  0x9c   :  { %1454 = vmatpush1.bf16.msra.mxu0 %v2517_v15  ;;  %v2191_v15 = vcombine.high %v291_v12, %v291_v12 }
  0x9d   :  { %1455 = vmatprep.subr.bf16.mxu0 %v2523_v16  ;;  %v2190_v16 = vcombine.low %v291_v12, %v291_v12 }
  0x9e   :  { %1679 = vmatpush1.bf16.msra.mxu1 %v2532_v19 }
  0x9f   :  { %1680 = vmatprep.subr.bf16.mxu1 %v2662_v50  ;;  %v1355_v17 = vsel %vm1353_vm1, %v2190_v16, 0 }
  0xa0   :  { %1456 = vmatpush1.bf16.msra.mxu0 %v2521_v13 }
  0xa1   :  { %1457 = vmatprep.subr.bf16.mxu0 %v2527_v18 }
  0xa2   :  { %1681 = vmatpush1.bf16.msra.mxu1 %v2536_v22  ;;  %v2611_v22 = vld [vmem:[%s2870_s3 + $0x40] sm:$0xff]  }
  0xa3   :  { %1682 = vmatprep.subr.bf16.mxu1 %v2662_v50 }
  0xa4   :  { %1458 = vmatpush1.bf16.msra.mxu0 %v2525_v20 }
  0xa5   :  { %1459 = vmatprep.subr.bf16.mxu0 %v2531_v21 }
  0xa6   :  { %1683 = vmatpush1.bf16.msra.mxu1 %v2540_v26  ;;  %v2614_v26 = vld [vmem:[%s2870_s3 + $0x8] sm:$0xff]  }
  0xa7   :  { %1684 = vmatprep.subr.bf16.mxu1 %v2662_v50 }
  0xa8   :  { %1460 = vmatpush1.bf16.msra.mxu0 %v2529_v23  ;;  %v2612_v23 = vld [vmem:[%s2870_s3] sm:$0xff]  }
  0xa9   :  { %1461 = vmatprep.subr.bf16.mxu0 %v2535_v25 }
  0xaa   :  { %1685 = vmatpush1.bf16.msra.mxu1 %v2544_v29  ;;  %v2617_v29 = vld [vmem:[%s2870_s3 + $0x58] sm:$0xff]  }
  0xab   :  { %1686 = vmatprep.subr.bf16.mxu1 %v2662_v50  ;;  %v2569_v50 = vld [vmem:[#allocation2 + $0x484] ss:$12 sps:$4 sm:$0xff]  }
  0xac   :  { %1462 = vmatpush1.bf16.msra.mxu0 %v2533_v27  ;;  %v2615_v27 = vld [vmem:[%s2870_s3 + $0x50] sm:$0xff]  }
  0xad   :  { %1463 = vmatprep.subr.bf16.mxu0 %v2539_v28  ;;  %v2616_v28 = vld [vmem:[%s2870_s3 + $0x10] sm:$0xff]  }
  0xae   :  { %1687 = vmatpush1.bf16.msra.mxu1 %v1361_v30  ;;  %v2618_v30 = vld [vmem:[%s2870_s3 + $0x18] sm:$0xff]  }
  0xaf   :  { %2287 = vmatprep.subr.bf16.mxu1 %v2611_v22 }
  0xb0   :  { %1464 = vmatpush1.bf16.msra.mxu0 %v2537_v31  ;;  %v2619_v31 = vld [vmem:[%s2870_s3 + $0x60] sm:$0xff]  }
  0xb1   :  { %1465 = vmatprep.subr.bf16.mxu0 %v2543_v32  ;;  %1691 = vmatmul.mubr.bf16.vlgmr.msra.gmra.mrb[12].mxu1 %v2774_v35  ;;  %v295_v32 = vlaneseq }
  0xb2   :  { %2288 = vmatpush3.bf16.msra.mxu1 %v2612_v23 }
  0xb3   :  { %2289 = vmatprep.subr.bf16.mxu1 %v2613_v24 }
  0xb4   :  { %1466 = vmatpush1.bf16.msra.mxu0 %v2541_v33  ;;  %v2620_v33 = vld [vmem:[%s2870_s3 + $0x20] sm:$0xff]  }
  0xb5   :  { %1467 = vmatprep.subr.bf16.mxu0 %v2547_v34  ;;  %v2621_v34 = vld [vmem:[%s2870_s3 + $0x68] sm:$0xff]  }
  0xb6   :  { %2290 = vmatpush3.bf16.msra.mxu1 %v2614_v26  ;;  %v2627_v26 = vld [vmem:[%s2870_s3 + $0x80] sm:$0xff]  }
  0xb7   :  { %2291 = vmatprep.subr.bf16.mxu1 %v2615_v27  ;;  %v2628_v27 = vld [vmem:[%s2870_s3 + $0x88] sm:$0xff]  }
  0xb8   :  { %1468 = vmatpush1.bf16.msra.mxu0 %v2545_v36  ;;  %v2622_v36 = vld [vmem:[%s2870_s3 + $0x28] sm:$0xff]  }
  0xb9   :  { %1469 = vmatprep.subr.bf16.mxu0 %v2551_v37 }
  0xba   :  { %2292 = vmatpush3.bf16.msra.mxu1 %v2616_v28  ;;  %v2629_v28 = vld [vmem:[%s2870_s3 + $0x90] sm:$0xff]  }
  0xbb   :  { %2293 = vmatprep.subr.bf16.mxu1 %v2617_v29  ;;  %v2630_v29 = vld [vmem:[%s2870_s3 + $0x98] sm:$0xff]  }
  0xbc   :  { %1470 = vmatpush1.bf16.msra.mxu0 %v2549_v38  ;;  %v293_v38 = vld [vmem:[%s2869_s2] sm:$0x7] }
  0xbd   :  { %1471 = vmatprep.subr.bf16.mxu0 %v2554_v39 }
  0xbe   :  { %2294 = vmatpush3.bf16.msra.mxu1 %v2618_v30  ;;  %v2631_v30 = vld [vmem:[%s2870_s3 + $0xa0] sm:$0xff]  }
  0xbf   :  { %2295 = vmatprep.subr.bf16.mxu1 %v2619_v31  ;;  %v2632_v31 = vld [vmem:[%s2870_s3 + $0xa8] sm:$0xff]  }
  0xc0   :  { %1472 = vmatpush1.bf16.msra.mxu0 %v2552_v40 }
  0xc1   :  { %1473 = vmatprep.subr.bf16.mxu0 %v2557_v41 }
  0xc2   :  { %2296 = vmatpush3.bf16.msra.mxu1 %v2620_v33  ;;  %v2634_v33 = vld [vmem:[%s2870_s3 + $0xb8] sm:$0xff]  }
  0xc3   :  { %2297 = vmatprep.subr.bf16.mxu1 %v2621_v34 }
  0xc4   :  { %1474 = vmatpush1.bf16.msra.mxu0 %v2555_v42 }
  0xc5   :  { %1475 = vmatprep.subr.bf16.mxu0 %v2560_v43 }
  0xc6   :  { %2298 = vmatpush3.bf16.msra.mxu1 %v2622_v36 }
  0xc8   :  { %1476 = vmatpush1.bf16.msra.mxu0 %v2558_v44 }
  0xc9   :  { %1477 = vmatprep.subr.bf16.mxu0 %v2563_v45 }
  0xcc   :  { %1478 = vmatpush1.bf16.msra.mxu0 %v2561_v46 }
  0xcd   :  { %1479 = vmatprep.subr.bf16.mxu0 %v2566_v47 }
  0xd0   :  { %1480 = vmatpush1.bf16.msra.mxu0 %v2564_v49 }
  0xd1   :  { %1492 = vmatprep.subr.bf16.mxu0 %v2569_v50 }
  0xd3   :  { %1482 = vmatmul.mubr.bf16.vlgmr.msra.gmra.mrb[0].mxu0 %v2735_v48  ;;  %v2582_v48 = vld [vmem:[#allocation2 + $0x4f8] ss:$12 sps:$4 sm:$0xff]  }
  0xd4   :  { %1493 = vmatpush1.bf16.msra.mxu0 %v2567_v51  ;;  %2194 = vmatprep.mubr.msk.bf16.mxu0 %vm1349_vm0, %v2756_v4  ;;  %v2594_v4 = vld [vmem:[#allocation2 + $0x558] ss:$12 sps:$4 sm:$0xff]  }
  0xd5   :  { %1494 = vmatprep.subr.bf16.mxu0 %v2572_v52 }
  0xd8   :  { %1495 = vmatpush1.bf16.msra.mxu0 %v2570_v53 }
  0xd9   :  { %1496 = vmatprep.subr.bf16.mxu0 %v2575_v54 }
  0xdc   :  { %1497 = vmatpush1.bf16.msra.mxu0 %v2573_v55 }
  0xdd   :  { %1498 = vmatprep.subr.bf16.mxu0 %v2578_v56 }
  0xe0   :  { %1499 = vmatpush1.bf16.msra.mxu0 %v2576_v57 }
  0xe1   :  { %1500 = vmatprep.subr.bf16.mxu0 %v2581_v58 }
  0xe4   :  { %1501 = vmatpush1.bf16.msra.mxu0 %v2579_v59  ;;  %v2623_v59 = vld [vmem:[%s2870_s3 + $0x70] sm:$0xff]  }
  0xe5   :  { %1502 = vmatprep.subr.bf16.mxu0 %v2584_v60  ;;  %v2624_v60 = vld [vmem:[%s2870_s3 + $0x30] sm:$0xff]   ;;  %2299 = vmatprep.subr.bf16.mxu1 %v2623_v59 }
  0xe6   :  { %2300 = vmatpush3.bf16.msra.mxu1 %v2624_v60 }
  0xe8   :  { %1503 = vmatpush1.bf16.msra.mxu0 %v2582_v48  ;;  %v2625_v48 = vld [vmem:[%s2870_s3 + $0x78] sm:$0xff]  }
  0xe9   :  { %1504 = vmatprep.subr.bf16.mxu0 %v2587_v61  ;;  %v2626_v61 = vld [vmem:[%s2870_s3 + $0x38] sm:$0xff]   ;;  %2301 = vmatprep.subr.bf16.mxu1 %v2625_v48 }
  0xea   :  { %2302 = vmatpush3.bf16.msra.mxu1 %v2626_v61 }
  0xec   :  { %1505 = vmatpush1.bf16.msra.mxu0 %v2585_v62  ;;  %v2663_v62 = vmov 0.0  }
  0xed   :  { %1506 = vmatprep.subr.bf16.mxu0 %v2590_v63  ;;  %2318 = vmatprep.subr.bf16.mxu1 %v2663_v62 }
  0xf0   :  { %1507 = vmatpush1.bf16.msra.mxu0 %v2588_v0 }
  0xf1   :  { %1508 = vmatprep.subr.bf16.mxu0 %v2593_v1 }
  0xf4   :  { %1509 = vmatpush1.bf16.msra.mxu0 %v2591_v2 }
  0xf5   :  { %1510 = vmatprep.subr.bf16.mxu0 %v2596_v3 }
  0xf8   :  { %1511 = vmatpush1.bf16.msra.mxu0 %v2594_v4 }
  0xf9   :  { %1512 = vmatprep.subr.bf16.mxu0 %v2599_v5 }
  0xfc   :  { %1513 = vmatpush1.bf16.msra.mxu0 %v2597_v6 }
  0xfd   :  { %1514 = vmatprep.subr.bf16.mxu0 %v2602_v7 }
 0x100   :  { %1515 = vmatpush1.bf16.msra.mxu0 %v2600_v8 }
 0x101   :  { %1516 = vmatprep.subr.bf16.mxu0 %v2605_v9 }
 0x104   :  { %1517 = vmatpush1.bf16.msra.mxu0 %v2603_v10 }
 0x105   :  { %1518 = vmatprep.subr.bf16.mxu0 %v2608_v11 }
 0x108   :  { %1519 = vmatpush1.bf16.msra.mxu0 %v2606_v14  ;;  %v2237_v13 = vpop.f32.mrb[0].mxu1 }
 0x109   :  { %2193 = vmatprep.subr.msk.bf16.mxu0 %vm1353_vm1, %v2191_v15  ;;  %v2238_v18 = vpop.f32.mrb[1].mxu1 }
 0x10a   :  { %v2239_v19 = vadd.f32 %v2238_v18, %v2237_v13  ;;  %v2240_v20 = vpop.f32.mrb[2].mxu1 }
 0x10b   :  { %v2241_v21 = vpop.f32.mrb[3].mxu1 }
 0x10c   :  { %1521 = vmatpush1.bf16.msra.mxu0 %v1355_v17  ;;  %v2242_v25 = vadd.f32 %v2241_v21, %v2240_v20 }
 0x10f   :  { %1525 = vmatmul.mubr.bf16.vlgmr.msra.gmra.mrb[0].mxu0 %v2774_v35  ;;  %v296_v35 = vshrl.u32 %v295_v32, 7  ;;  %v2633_v32 = vld [vmem:[%s2870_s3 + $0xb0] sm:$0xff]  }
 0x111   :  { %v305_v37 = vsub.s32 2, %v296_v35  ;;  %v297_v8 = vsub.s32 0, %v296_v35  ;;  %v301_v9 = vsub.s32 1, %v296_v35 }
 0x113   :  { %v306_v39 = vrot.slane %v293_v38, %v305_v37  ;;  %v298_v10 = vrot.slane %v293_v38, %v297_v8  ;;  %v302_v11 = vrot.slane %v293_v38, %v301_v9 }
 0x115   :  { %v1570_v40 = vadd.f32 %v2239_v19, %v306_v39  ;;  %v1573_v43 = vadd.f32 %v2242_v25, %v306_v39 }
 0x128   :  { %v2259_v41 = vpop.f32.mrb[4].mxu1 }
 0x129   :  { %v2260_v42 = vpop.f32.mrb[5].mxu1 }
 0x12a   :  { %v2261_v44 = vadd.f32 %v2260_v42, %v2259_v41  ;;  %v2262_v45 = vpop.f32.mrb[6].mxu1 }
 0x12b   :  { %v2263_v46 = vpop.f32.mrb[7].mxu1 }
 0x12c   :  { %v1611_v47 = vadd.f32 %v2261_v44, %v1570_v40  ;;  %v2264_v49 = vadd.f32 %v2263_v46, %v2262_v45  ;;  %v2196_v40 = vld [vmem:[%s2871_s4] ss:$0 sm:$0xff] }
 0x12e   :  { %v1614_v50 = vadd.f32 %v2264_v49, %v1573_v43 }
 0x148   :  { %v2281_v51 = vpop.f32.mrb[8].mxu1 }
 0x149   :  { %v2282_v52 = vpop.f32.mrb[9].mxu1 }
 0x14a   :  { %v2283_v53 = vadd.f32 %v2282_v52, %v2281_v51  ;;  %v2284_v54 = vpop.f32.mrb[10].mxu1 }
 0x14b   :  { %v2285_v55 = vpop.f32.mrb[11].mxu1 }
 0x14c   :  { %v2286_v56 = vadd.f32 %v2285_v55, %v2284_v54  ;;  %v1652_v57 = vadd.f32 %v2283_v53, %v1611_v47 }
 0x14e   :  { %v1655_v58 = vadd.f32 %v2286_v56, %v1614_v50 }
 0x184   :  { %v1692_v63 = vpop.f32.mrb[12].mxu1 }
 0x185   :  { %v1693_v0 = vadd.f32 %v1692_v63, %v1652_v57  ;;  %v1694_v1 = vpop.f32.mrb[13].mxu1 }
 0x186   :  { %v1695_v2 = vpop.f32.mrb[14].mxu1 }
 0x187   :  { %v1701_v3 = vmax.f32 %v1693_v0, 0.0  ;;  %v1696_v4 = vadd.f32 %v1695_v2, %v1655_v58  ;;  %v1697_v5 = vpop.f32.mrb[15].mxu1 }
 0x189   :  { %v1704_v6 = vmax.f32 %v1696_v4, 0.0 }
 0x18b   :  { %v1707_v7 = vpack.c.bf16 %v1704_v6, %v1701_v3 }
 0x1e2   :  { %v1526_v12 = vpop.f32.mrb[0].mxu0 }
 0x1e3   :  { %v2338_v14 = vadd.f32 %v1526_v12, %v298_v10  ;;  %v1528_v15 = vpop.f32.mrb[1].mxu0 }
 0x1e4   :  { %v2339_v16 = vadd.f32 %v1528_v15, %v302_v11  ;;  %v1530_v17 = vpop.f32.mrb[2].mxu0 }
 0x1e5   :  { %v2340_v13 = vadd.f32 %v1530_v17, %v298_v10  ;;  %v1532_v18 = vpop.f32.mrb[3].mxu0  ;;  %v1699_v20 = vmax.f32 %v2338_v14, 0.0 }
 0x1e6   :  { %v2341_v19 = vadd.f32 %v1532_v18, %v302_v11  ;;  %v1700_v22 = vmax.f32 %v2339_v16, 0.0 }
 0x1e7   :  { %v1702_v21 = vmax.f32 %v2340_v13, 0.0 }
 0x1e8   :  { %v1703_v23 = vmax.f32 %v2341_v19, 0.0 }
 0x1e9   :  { %v1705_v24 = vpack.c.bf16 %v1702_v21, %v1699_v20 }
 0x1ea   :  { %v1706_v25 = vpack.c.bf16 %v1703_v23, %v1700_v22 }
 0x1ec   :  { %1939 = vmatprep.mubr.bf16.mxu1 %v1706_v25 }
 0x1ed   :  { %1940 = vmatmul.mubr.bf16.vlgmr.msra.gmra.mrb[16].mxu1 %v1705_v24 }
 0x1ee   :  { %2319 = vmatpush3.bf16.msra.mxu1 %v2627_v26  ;;  %2334 = vmatprep.mubr.msk.bf16.mxu1 %vm2664_vm2, %v2663_v62 }
 0x1ef   :  { %2320 = vmatprep.subr.bf16.mxu1 %v2663_v62 }
 0x1f2   :  { %2321 = vmatpush3.bf16.msra.mxu1 %v2628_v27 }
 0x1f3   :  { %2322 = vmatprep.subr.bf16.mxu1 %v2663_v62 }
 0x1f6   :  { %2323 = vmatpush3.bf16.msra.mxu1 %v2629_v28 }
 0x1f7   :  { %2324 = vmatprep.subr.bf16.mxu1 %v2663_v62 }
 0x1fa   :  { %2325 = vmatpush3.bf16.msra.mxu1 %v2630_v29 }
 0x1fb   :  { %2326 = vmatprep.subr.bf16.mxu1 %v2663_v62 }
 0x1fe   :  { %2327 = vmatpush3.bf16.msra.mxu1 %v2631_v30 }
 0x1ff   :  { %2328 = vmatprep.subr.bf16.mxu1 %v2663_v62 }
 0x202   :  { %2329 = vmatpush3.bf16.msra.mxu1 %v2632_v31 }
 0x203   :  { %2330 = vmatprep.subr.bf16.mxu1 %v2663_v62 }
 0x206   :  { %2331 = vmatpush3.bf16.msra.mxu1 %v2633_v32 }
 0x207   :  { %2332 = vmatprep.subr.bf16.mxu1 %v2663_v62 }
 0x20a   :  { %2333 = vmatpush3.bf16.msra.mxu1 %v2634_v33 }
 0x20d   :  { %2335 = vmatmul.mubr.bf16.vlgmr.msra.gmra.mrb[20].mxu1 %v1707_v7 }
 0x2c0   :  { %v2303_v34 = vpop.f32.mrb[16].mxu1 }
 0x2c1   :  { %v2304_v35 = vpop.f32.mrb[17].mxu1 }
 0x2c2   :  { %v2305_v36 = vadd.f32 %v2304_v35, %v2303_v34  ;;  %v2306_v37 = vpop.f32.mrb[18].mxu1 }
 0x2c3   :  { %v2307_v38 = vpop.f32.mrb[19].mxu1 }
 0x2c4   :  { %v2308_v39 = vadd.f32 %v2307_v38, %v2306_v37  ;;  %v1942_v41 = vadd.f32 %v2305_v36, %v2196_v40 }
 0x2c6   :  { %v1945_v45 = vadd.f32 %v2308_v39, %v2196_v40 }
 0x2e0   :  { %v1982_v42 = vpop.f32.mrb[20].mxu1 }
 0x2e1   :  { %v1983_v43 = vadd.f32 %v1982_v42, %v1942_v41  ;;  %v2336_v44 = vpop.f32.mrb[21].mxu1 }
 0x2e2   :  { %v1985_v46 = vpop.f32.mrb[22].mxu1 }
 0x2e3   :  { %1989 = vst [vmem:[%s2872_s5] sm:$0xff] %v1983_v43  ;;  %v1986_v47 = vadd.f32 %v1985_v46, %v1945_v45  ;;  %v2337_v49 = vpop.f32.mrb[23].mxu1 }
 0x2e5   :  { %1990 = vst [vmem:[%s2872_s5 + $0x8] sm:$0xff] %v1986_v47 }
 0x2e6   :  { %1995 = vsyncpa [#allocation3], 1 }

</bundles_post_ra>
